<compile_context>
chip_gen: v7x
topology: tpu7x:2x2x1
jax: 0.10.0
libtpu: 0.0.40
codegen_flags: <defaults>
</compile_context>

<pallas_src>
import math

import jax
import jax.numpy as jnp
from jax.experimental import pallas as pl
from jax.experimental.pallas import tpu as pltpu


# ----------------------------------------------------------------------------
# Plain-JAX glue: build the unitary U exactly as the PyTorch module does.
# ----------------------------------------------------------------------------
def _rx(phi):
    c = jnp.cos(phi / 2).astype(jnp.complex64)
    s = jnp.sin(phi / 2).astype(jnp.complex64)
    return jnp.stack([c, -1j * s, -1j * s, c]).reshape(2, 2)


def _ry(phi):
    c = jnp.cos(phi / 2).astype(jnp.complex64)
    s = jnp.sin(phi / 2).astype(jnp.complex64)
    return jnp.stack([c, -s, s, c]).reshape(2, 2)


def _rz(phi):
    e_m = jnp.exp(-1j * phi.astype(jnp.complex64) / 2)
    e_p = jnp.exp(1j * phi.astype(jnp.complex64) / 2)
    zero = jnp.zeros((), jnp.complex64)
    return jnp.stack([e_m, zero, zero, e_p]).reshape(2, 2)


def _multi_kron(x_list):
    x_k = jnp.ones((1, 1), jnp.complex64)
    for x in x_list:
        x_k = jnp.kron(x_k, x)
    return x_k


def _gate_expand_1toN(U, N, target):
    eye2 = jnp.eye(2, dtype=jnp.complex64)
    return _multi_kron([eye2] * target + [U] + [eye2] * (N - target - 1))


def _gate_sequence_product(U_list, n_qubits, left_to_right=True):
    U_overall = jnp.eye(2 ** n_qubits, dtype=jnp.complex64)
    for U in U_list:
        if left_to_right:
            U_overall = U @ U_overall
        else:
            U_overall = U_overall @ U
    return U_overall


class InitCirV:
    """JAX port of init_cir_v (deterministic in-script init)."""

    def __init__(self, n_qubits=2, gain=2 ** 0.5, use_wscale=True, lrmul=1,
                 key=jax.random.PRNGKey(0)):
        he_std = gain * 5 ** (-0.5)
        if use_wscale:
            init_std = 1.0 / lrmul
            self.w_mul = he_std * lrmul
        else:
            init_std = he_std / lrmul
            self.w_mul = lrmul
        self.weight = jax.random.uniform(
            key, (n_qubits * 3,), jnp.float32, 0.0, 2.0 * math.pi) * init_std
        self.n_qubits = n_qubits

    def valueQ(self):
        w = self.weight * self.w_mul
        cir = []
        for q in range(self.n_qubits):
            cir.append(_gate_expand_1toN(_rx(w[q * 3 + 0]), self.n_qubits, q))
            cir.append(_gate_expand_1toN(_ry(w[q * 3 + 1]), self.n_qubits, q))
            cir.append(_gate_expand_1toN(_rz(w[q * 3 + 2]), self.n_qubits, q))
        return _gate_sequence_product(cir, self.n_qubits)


# ----------------------------------------------------------------------------
# Pallas kernel: one real matmul per row block.
#   x_ref: (TB, GC)   interleaved re/im, g batch items per row
#   w_ref: (GC, GC)   kron(I_g, W_int)   (constant block, fetched once)
# ----------------------------------------------------------------------------
def _value_matmul_kernel(w_ref, x_ref, o_ref):
    o_ref[...] = jnp.dot(x_ref[...], w_ref[...],
                         preferred_element_type=jnp.float32)


def _round_up(x, m):
    return ((x + m - 1) // m) * m


def quantum_value(U, x):
    """Compute U @ x @ dag(U) for a batch of complex matrices x: (B, D, D)."""
    B, D, _ = x.shape
    D2 = D * D
    C = 2 * D2                      # interleaved re/im width per batch item

    # --- constant weight: real embedding of M = kron(U, conj(U)) -----------
    M = jnp.kron(U, jnp.conj(U))                    # (D2, D2) complex64
    Mr = jnp.real(M).astype(jnp.float32)
    Mi = jnp.imag(M).astype(jnp.float32)
    MrT, MiT = Mr.T, Mi.T
    # W_int[2j+a, 2k+b]: a/b = 0(re)/1(im) of input/output component.
    b_re = jnp.stack([MrT, MiT], axis=-1)           # input-real rows
    b_im = jnp.stack([-MiT, MrT], axis=-1)          # input-imag rows
    W_int = jnp.stack([b_re, b_im], axis=1).reshape(C, C)   # (C, C) f32

    # Lane-dense grouping: g consecutive batch items per kernel row.
    g = max(1, 256 // C)                            # 256-wide lane blocks
    GC = g * C
    W_big = jnp.kron(jnp.eye(g, dtype=jnp.float32), W_int) if g > 1 else W_int

    # --- interleaved f32 view of x, batch in rows ---------------------------
    # (Mosaic has no complex dtype; this stack is the single pre-pass.)
    x_int = jnp.stack([jnp.real(x), jnp.imag(x)], axis=-1)  # (B, D, D, 2) f32
    x_flat = x_int.reshape(B, C)

    B_pad = _round_up(B, g)
    if B_pad != B:
        x_flat = jnp.pad(x_flat, ((0, B_pad - B), (0, 0)))
    R = B_pad // g
    x_rows = x_flat.reshape(R, GC)                  # contiguous -> free

    # Row-block size: large blocks to amortize per-step overhead, >=2 grid
    # steps whenever possible (v7x megacore), multiple of 8 sublanes; the
    # last block is clipped by Pallas (no block-size padding).
    if R <= 8:
        TB = R
    else:
        TB = min(4096, _round_up(pl.cdiv(R, 2), 8))
    grid = (pl.cdiv(R, TB),)

    out_rows = pl.pallas_call(
        _value_matmul_kernel,
        out_shape=jax.ShapeDtypeStruct((R, GC), jnp.float32),
        grid=grid,
        in_specs=[
            pl.BlockSpec((GC, GC), lambda i: (0, 0)),   # constant weight
            pl.BlockSpec((TB, GC), lambda i: (i, 0)),   # row block (lane-dense)
        ],
        out_specs=pl.BlockSpec((TB, GC), lambda i: (i, 0)),
        compiler_params=pltpu.CompilerParams(
            dimension_semantics=("parallel",),
            vmem_limit_bytes=32 * 1024 * 1024),
    )(W_big, x_rows)

    # --- back to complex (single post-pass) ---------------------------------
    out_flat = out_rows.reshape(B_pad, D, D, 2)
    if B_pad != B:
        out_flat = out_flat[:B]
    return jax.lax.complex(out_flat[..., 0], out_flat[..., 1])


def forward(module: InitCirV, x):
    U = module.valueQ()
    return quantum_value(U, x)


# ----------------------------------------------------------------------------
if __name__ == "__main__":
    key = jax.random.PRNGKey(0)
    k_mod, k_xr, k_xi = jax.random.split(key, 3)

    n_qubits = 2
    D = 2 ** n_qubits          # 4
    B = 2                      # small batch of (D, D) complex matrices

    module = InitCirV(n_qubits=n_qubits, key=k_mod)

    xr = jax.random.normal(k_xr, (B, D, D), jnp.float32)
    xi = jax.random.normal(k_xi, (B, D, D), jnp.float32)
    x = (xr + 1j * xi).astype(jnp.complex64)

    out = forward(module, x)
    out = jax.block_until_ready(out)

    # Pure-JAX complex reference for correctness.
    U = module.valueQ()
    expected = jnp.einsum("ij,bjk,kl->bil", U, x, jnp.conj(U).T)
    assert out.shape == (B, D, D) and out.dtype == jnp.complex64
    assert jnp.allclose(out, expected, rtol=1e-4, atol=1e-4)

    print("KERNEL_OK")
</pallas_src>

<mosaic_0001>
module attributes {stable_mosaic.version = 11 : i64} {
  func.func @_value_matmul_kernel(%arg0: i32, %arg1: memref<256x256xf32, #tpu.memory_space<vmem>>, %arg2: memref<1x256xf32, #tpu.memory_space<vmem>>, %arg3: memref<1x256xf32, #tpu.memory_space<vmem>>) attributes {dimension_semantics = [#tpu.dimension_semantics<parallel>], iteration_bounds = array<i64: 1>, scalar_prefetch = 0 : i64, scratch_operands = 0 : i64, tpu.core_type = #tpu.core_type<tc>, window_params = [{pipeline_mode = #tpu.pipeline_mode<synchronous>, transform_indices = @transform_0, window_bounds = array<i64: 256, 256>}, {transform_indices = @transform_1, window_bounds = array<i64: 1, 256>}, {transform_indices = @transform_2, window_bounds = array<i64: 1, 256>}]} {
    %c0 = arith.constant 0 : index
    %c0_0 = arith.constant 0 : index
    %0 = vector.load %arg2[%c0, %c0_0] : memref<1x256xf32, #tpu.memory_space<vmem>>, vector<1x256xf32>
    %c0_1 = arith.constant 0 : index
    %c0_2 = arith.constant 0 : index
    %1 = vector.load %arg1[%c0_1, %c0_2] : memref<256x256xf32, #tpu.memory_space<vmem>>, vector<256x256xf32>
    %cst = arith.constant dense<0.000000e+00> : vector<1x256xf32>
    %2 = tpu.matmul %0, %1, %cst {dimension_numbers = #tpu.dot_dimension_numbers<[1], [0], [0], [1], [0, 0, 1, 1], [], []>} : vector<1x256xf32>, vector<256x256xf32>, vector<1x256xf32> -> vector<1x256xf32>
    %c0_3 = arith.constant 0 : index
    %c0_4 = arith.constant 0 : index
    %3 = vector.load %arg3[%c0_3, %c0_4] : memref<1x256xf32, #tpu.memory_space<vmem>>, vector<1x256xf32>
    tpu.vector_store %arg3[%c0_3, %c0_4], %2 {strides = array<i32>} : memref<1x256xf32, #tpu.memory_space<vmem>>, vector<1x256xf32>,
    return
  }
  func.func @transform_0(%arg0: i32) -> (i32, i32) {
    %c0_i32 = arith.constant 0 : i32
    %c0_i32_0 = arith.constant 0 : i32
    %c0_i32_1 = arith.constant 0 : i32
    return %c0_i32, %c0_i32_0 : i32, i32
  }
  func.func @transform_1(%arg0: i32) -> (i32, i32) {
    %c0_i32 = arith.constant 0 : i32
    %c0_i32_0 = arith.constant 0 : i32
    return %arg0, %c0_i32 : i32, i32
  }
  func.func @transform_2(%arg0: i32) -> (i32, i32) {
    %c0_i32 = arith.constant 0 : i32
    %c0_i32_0 = arith.constant 0 : i32
    return %arg0, %c0_i32 : i32, i32
  }
}

</mosaic_0001>

<bundles_post_ra>
// kernel: tpu_custom_call.1
= control target key start
LH: loop header
LB: loop body
LE: loop exit
PB: predicated region body
PF: predicated region fallthrough
CT: control target
= control target key end

     0   :  { %7 = vsyncpa [#allocation3], 0  ;;  %s386_s0 = inlined_call_operand.hbm [shape: f32[256,256], index: 0, kind: input, shape index: {}]   ;;  %s387_s1 = inlined_call_operand.vmem [shape: f32[1,256], index: 1, kind: input, shape index: {}]   ;;  %s388_s2 = inlined_call_operand.hbm [shape: f32[1,256], index: 2, kind: output, shape index: {}]  }
   0x1   :  { %8 = vsyncpa [#allocation4], 0  ;;  %s328_s9 = smov [#allocation2]   ;;  %s280_s13 = scalar_lea.hbm %s386_s0, 8192 }
   0x2   :  { %s14_s10 = sshll.u32 %s328_s9, 4  ;;  %p281_p0 = scmp.ne.s32.totalorder %s386_s0, %s280_s13  ;;  %s15_s10 = int_to_ptr.vmem [resolvable:$true] %s14_s10 }
   0x3   :  { %p284_p1 = scmp.lt.u32.totalorder %s280_s13, %s386_s0 }
   0x5   :  { %p286_p2 = pnand %p284_p1, %p281_p0 }
   0x7   :  { %289 = shalt.err (!%p286_p2)
}
   0x8   :  { %s290_s18 = scalar_lea.vmem %s15_s10, 8192  ;;  %p295_p4 = scmp.lt.s32.totalorder %s15_s10, %s15_s10 }
   0x9   :  { %p291_p3 = scmp.ne.s32.totalorder %s15_s10, %s290_s18  ;;  %p296_p5 = scmp.lt.s32.totalorder %s290_s18, %s290_s18 }
   0xb   :  { %p297_p6 = por %p296_p5, %p295_p4 }
   0xd   :  { %p298_p7 = pnand %p297_p6, %p291_p3 }
   0xf   :  { %301 = shalt.err (!%p298_p7)
}
  0x10   :  { %s329_s19 = smov 256   ;;  %s330_s20 = smov 16  }
  0x11   :  { %20 = dma.hbm_to_vmem [thread:$0]  %s386_s0, 8192, %s15_s10, [#allocation3], %s329_s19, %s329_s19, %s330_s20  }
  0x12   :  { %324 = dma.done.wait [#allocation3], 8192  }
  0x13   :  { %325 = vsyncadd [#allocation3], 4294959104  ;;  %v28_v0 = vld [vmem:[#allocation2 + $0x8] sm:$0xff]  ;;  %v30_v1 = vld [vmem:[#allocation2 + $0x18] sm:$0xff]  ;;  %v92_v25 = vlaneseq }
  0x14   :  { %v27_v2 = vld [vmem:[#allocation2] sm:$0xff]  ;;  %v211_v3 = vpack.c.bf16 %v30_v1, %v28_v0  ;;  %v29_v4 = vld [vmem:[#allocation2 + $0x10] sm:$0xff]  ;;  %v32_v5 = vld [vmem:[#allocation2 + $0x28] sm:$0xff] }
  0x15   :  { %v34_v6 = vld [vmem:[#allocation2 + $0x38] sm:$0xff]  ;;  %v213_v7 = vpack.c.bf16 %v29_v4, %v27_v2  ;;  %v31_v9 = vld [vmem:[#allocation2 + $0x20] sm:$0xff]  ;;  %v33_v10 = vld [vmem:[#allocation2 + $0x30] sm:$0xff]  ;;  %v361_v32 = vshrl.u32 %v92_v25, 7  ;;  %vm193_vm0 = vcmp.lt.s32.totalorder %v92_v25, 256 }
  0x16   :  { %v215_v8 = vpack.c.bf16 %v34_v6, %v32_v5  ;;  %v36_v11 = vld [vmem:[#allocation2 + $0x48] sm:$0xff]  ;;  %212 = vmatprep.subr.bf16.mxu0 %v211_v3  ;;  %v38_v12 = vld [vmem:[#allocation2 + $0x58] sm:$0xff]  ;;  %v217_v13 = vpack.c.bf16 %v33_v10, %v31_v9  ;;  %v35_v15 = vld [vmem:[#allocation2 + $0x40] sm:$0xff] }
  0x17   :  { %214 = vmatpush1.bf16.msra.mxu0 %v213_v7  ;;  %v219_v14 = vpack.c.bf16 %v38_v12, %v36_v11  ;;  %v37_v16 = vld [vmem:[#allocation2 + $0x50] sm:$0xff]  ;;  %v40_v17 = vld [vmem:[#allocation2 + $0x68] sm:$0xff]  ;;  %v42_v18 = vld [vmem:[#allocation2 + $0x78] sm:$0xff]  ;;  %v98_v39 = vsub.s32 1, %v361_v32 }
  0x18   :  { %216 = vmatprep.subr.bf16.mxu0 %v215_v8  ;;  %v221_v19 = vpack.c.bf16 %v37_v16, %v35_v15  ;;  %v223_v20 = vpack.c.bf16 %v42_v18, %v40_v17  ;;  %v39_v21 = vld [vmem:[#allocation2 + $0x60] sm:$0xff]  ;;  %v41_v22 = vld [vmem:[#allocation2 + $0x70] sm:$0xff]  ;;  %v44_v23 = vld [vmem:[#allocation2 + $0x88] sm:$0xff] }
  0x19   :  { %v46_v24 = vld [vmem:[#allocation2 + $0x98] sm:$0xff]  ;;  %v225_v26 = vpack.c.bf16 %v41_v22, %v39_v21  ;;  %v43_v28 = vld [vmem:[#allocation2 + $0x80] sm:$0xff]  ;;  %v45_v29 = vld [vmem:[#allocation2 + $0x90] sm:$0xff] }
  0x1a   :  { %v227_v27 = vpack.c.bf16 %v46_v24, %v44_v23  ;;  %v48_v30 = vld [vmem:[#allocation2 + $0xa8] sm:$0xff]  ;;  %v50_v31 = vld [vmem:[#allocation2 + $0xb8] sm:$0xff]  ;;  %v229_v33 = vpack.c.bf16 %v45_v29, %v43_v28  ;;  %v47_v35 = vld [vmem:[#allocation2 + $0xa0] sm:$0xff] }
  0x1b   :  { %218 = vmatpush1.bf16.msra.mxu0 %v217_v13  ;;  %v231_v34 = vpack.c.bf16 %v50_v31, %v48_v30  ;;  %v49_v36 = vld [vmem:[#allocation2 + $0xb0] sm:$0xff]  ;;  %v52_v37 = vld [vmem:[#allocation2 + $0xc8] sm:$0xff]  ;;  %v54_v38 = vld [vmem:[#allocation2 + $0xd8] sm:$0xff] }
  0x1c   :  { %220 = vmatprep.subr.bf16.mxu0 %v219_v14  ;;  %v233_v40 = vpack.c.bf16 %v49_v36, %v47_v35  ;;  %v235_v41 = vpack.c.bf16 %v54_v38, %v52_v37  ;;  %v51_v42 = vld [vmem:[#allocation2 + $0xc0] sm:$0xff]  ;;  %v53_v43 = vld [vmem:[#allocation2 + $0xd0] sm:$0xff]  ;;  %v56_v45 = vld [vmem:[#allocation2 + $0xe8] sm:$0xff]  ;;  %v94_v38 = vsub.s32 0, %v361_v32 }
  0x1d   :  { %v367_v44 = vld [vmem:[%s387_s1] sm:$0x3]  ;;  %v58_v46 = vld [vmem:[#allocation2 + $0xf8] sm:$0xff]  ;;  %v237_v48 = vpack.c.bf16 %v53_v43, %v51_v42  ;;  %v57_v51 = vld [vmem:[#allocation2 + $0xf0] sm:$0xff]  ;;  %s332_s1 = smov [#allocation5]  }
  0x1e   :  { %v99_v47 = vrot.slane %v367_v44, %v98_v39  ;;  %v239_v49 = vpack.c.bf16 %v58_v46, %v56_v45  ;;  %v55_v50 = vld [vmem:[#allocation2 + $0xe0] sm:$0xff]  ;;  %v60_v52 = vld [vmem:[#allocation2 + $0x108] sm:$0xff]  ;;  %v62_v53 = vld [vmem:[#allocation2 + $0x118] sm:$0xff]  ;;  %s202_s24 = sshll.u32 %s332_s1, 4  ;;  %s203_s24 = int_to_ptr.vmem [resolvable:$true] %s202_s24 }
  0x1f   :  { %222 = vmatpush1.bf16.msra.mxu0 %v221_v19  ;;  %v241_v54 = vpack.c.bf16 %v57_v51, %v55_v50  ;;  %v243_v55 = vpack.c.bf16 %v62_v53, %v60_v52  ;;  %v59_v56 = vld [vmem:[#allocation2 + $0x100] sm:$0xff]  ;;  %v61_v57 = vld [vmem:[#allocation2 + $0x110] sm:$0xff]  ;;  %v64_v58 = vld [vmem:[#allocation2 + $0x128] sm:$0xff]  ;;  %s302_s25 = scalar_lea.vmem %s203_s24, 32  ;;  %p307_p9 = scmp.lt.s32.totalorder %s203_s24, %s203_s24 }
  0x20   :  { %224 = vmatprep.subr.bf16.mxu0 %v223_v20  ;;  %166 = vmatprep.mubr.f32.mxu0 %v99_v47  ;;  %v66_v59 = vld [vmem:[#allocation2 + $0x138] sm:$0xff]  ;;  %v245_v60 = vpack.c.bf16 %v61_v57, %v59_v56  ;;  %v63_v62 = vld [vmem:[#allocation2 + $0x120] sm:$0xff]  ;;  %v65_v63 = vld [vmem:[#allocation2 + $0x130] sm:$0xff]  ;;  %p303_p8 = scmp.ne.s32.totalorder %s203_s24, %s302_s25  ;;  %p308_p10 = scmp.lt.s32.totalorder %s302_s25, %s302_s25 }
  0x21   :  { %v247_v61 = vpack.c.bf16 %v66_v59, %v64_v58  ;;  %v68_v0 = vld [vmem:[#allocation2 + $0x148] sm:$0xff]  ;;  %v70_v1 = vld [vmem:[#allocation2 + $0x158] sm:$0xff]  ;;  %v249_v2 = vpack.c.bf16 %v65_v63, %v63_v62  ;;  %v67_v4 = vld [vmem:[#allocation2 + $0x140] sm:$0xff] }
  0x22   :  { %v251_v3 = vpack.c.bf16 %v70_v1, %v68_v0  ;;  %v69_v5 = vld [vmem:[#allocation2 + $0x150] sm:$0xff]  ;;  %v72_v6 = vld [vmem:[#allocation2 + $0x168] sm:$0xff]  ;;  %v74_v7 = vld [vmem:[#allocation2 + $0x178] sm:$0xff]  ;;  %p309_p11 = por %p308_p10, %p307_p9 }
  0x23   :  { %226 = vmatpush1.bf16.msra.mxu0 %v225_v26  ;;  %v253_v8 = vpack.c.bf16 %v69_v5, %v67_v4  ;;  %v255_v9 = vpack.c.bf16 %v74_v7, %v72_v6  ;;  %v71_v10 = vld [vmem:[#allocation2 + $0x160] sm:$0xff]  ;;  %v73_v11 = vld [vmem:[#allocation2 + $0x170] sm:$0xff]  ;;  %v76_v12 = vld [vmem:[#allocation2 + $0x188] sm:$0xff] }
  0x24   :  { %228 = vmatprep.subr.bf16.mxu0 %v227_v27  ;;  %v78_v13 = vld [vmem:[#allocation2 + $0x198] sm:$0xff]  ;;  %v257_v14 = vpack.c.bf16 %v73_v11, %v71_v10  ;;  %v75_v16 = vld [vmem:[#allocation2 + $0x180] sm:$0xff]  ;;  %v77_v17 = vld [vmem:[#allocation2 + $0x190] sm:$0xff]  ;;  %p310_p12 = pnand %p309_p11, %p303_p8 }
  0x25   :  { %v259_v15 = vpack.c.bf16 %v78_v13, %v76_v12  ;;  %v80_v18 = vld [vmem:[#allocation2 + $0x1a8] sm:$0xff]  ;;  %v82_v19 = vld [vmem:[#allocation2 + $0x1b8] sm:$0xff]  ;;  %v261_v20 = vpack.c.bf16 %v77_v17, %v75_v16  ;;  %v79_v22 = vld [vmem:[#allocation2 + $0x1a0] sm:$0xff] }
  0x26   :  { %v263_v21 = vpack.c.bf16 %v82_v19, %v80_v18  ;;  %v81_v23 = vld [vmem:[#allocation2 + $0x1b0] sm:$0xff]  ;;  %v84_v24 = vld [vmem:[#allocation2 + $0x1c8] sm:$0xff]  ;;  %v86_v26 = vld [vmem:[#allocation2 + $0x1d8] sm:$0xff] }
  0x27   :  { %230 = vmatpush1.bf16.msra.mxu0 %v229_v33  ;;  %v265_v27 = vpack.c.bf16 %v81_v23, %v79_v22  ;;  %v267_v28 = vpack.c.bf16 %v86_v26, %v84_v24  ;;  %v83_v29 = vld [vmem:[#allocation2 + $0x1c0] sm:$0xff]  ;;  %v85_v30 = vld [vmem:[#allocation2 + $0x1d0] sm:$0xff]  ;;  %v88_v31 = vld [vmem:[#allocation2 + $0x1e8] sm:$0xff] }
  0x28   :  { %232 = vmatprep.subr.bf16.mxu0 %v231_v34  ;;  %v90_v33 = vld [vmem:[#allocation2 + $0x1f8] sm:$0xff]  ;;  %v269_v34 = vpack.c.bf16 %v85_v30, %v83_v29  ;;  %v87_v36 = vld [vmem:[#allocation2 + $0x1e0] sm:$0xff]  ;;  %v89_v37 = vld [vmem:[#allocation2 + $0x1f0] sm:$0xff] }
  0x29   :  { %v271_v35 = vpack.c.bf16 %v90_v33, %v88_v31  ;;  %v273_v39 = vpack.c.bf16 %v89_v37, %v87_v36 }
  0x2b   :  { %234 = vmatpush1.bf16.msra.mxu0 %v233_v40  ;;  %v95_v40 = vrot.slane %v367_v44, %v94_v38 }
  0x2c   :  { %236 = vmatprep.subr.bf16.mxu0 %v235_v41  ;;  %v331_v41 = vmov 1966171168  }
  0x2d   :  { %v177_v42 = vunpack.c.l.s4 %v331_v41 }
  0x2f   :  { %238 = vmatpush1.bf16.msra.mxu0 %v237_v48  ;;  %v178_v43 = vunpack.c.0.s8 %v177_v42 }
  0x30   :  { %240 = vmatprep.subr.bf16.mxu0 %v239_v49 }
  0x31   :  { %v181_v46 = vsub.s32 %v178_v43, %v361_v32 }
  0x33   :  { %242 = vmatpush1.bf16.msra.mxu0 %v241_v54 }
  0x34   :  { %244 = vmatprep.subr.bf16.mxu0 %v243_v55 }
  0x37   :  { %246 = vmatpush1.bf16.msra.mxu0 %v245_v60 }
  0x38   :  { %248 = vmatprep.subr.bf16.mxu0 %v247_v61 }
  0x3b   :  { %250 = vmatpush1.bf16.msra.mxu0 %v249_v2 }
  0x3c   :  { %252 = vmatprep.subr.bf16.mxu0 %v251_v3 }
  0x3f   :  { %254 = vmatpush1.bf16.msra.mxu0 %v253_v8 }
  0x40   :  { %256 = vmatprep.subr.bf16.mxu0 %v255_v9 }
  0x43   :  { %258 = vmatpush1.bf16.msra.mxu0 %v257_v14 }
  0x44   :  { %260 = vmatprep.subr.bf16.mxu0 %v259_v15 }
  0x47   :  { %262 = vmatpush1.bf16.msra.mxu0 %v261_v20 }
  0x48   :  { %264 = vmatprep.subr.bf16.mxu0 %v263_v21 }
  0x4b   :  { %266 = vmatpush1.bf16.msra.mxu0 %v265_v27 }
  0x4c   :  { %268 = vmatprep.subr.bf16.mxu0 %v267_v28 }
  0x4f   :  { %270 = vmatpush1.bf16.msra.mxu0 %v269_v34 }
  0x50   :  { %272 = vmatprep.subr.bf16.mxu0 %v271_v35 }
  0x53   :  { %274 = vmatpush1.bf16.msra.mxu0 %v273_v39 }
  0x56   :  { %167 = vmatmul.mubr.f32.vlgmr.msra.gmra.mrb[0].mxu0 %v95_v40 }
 0x129   :  { %v168_v45 = vpop.f32.mrb[0].mxu0 }
 0x12a   :  { %v170_v47 = vpop.f32.mrb[1].mxu0 }
 0x12b   :  { %v175_v48 = vcombine.low %v168_v45, %v170_v47 }
 0x12d   :  { %v182_v49 = vrot.slane %v175_v48, %v181_v46 }
 0x12f   :  { %v189_v50 = vrot.slane %v182_v49, %v181_v46 }
 0x131   :  { %195 = vst.msk [vmem:[#allocation5] sm:$0x3] %vm193_vm0, %v189_v50 }
 0x132   :  { %313 = shalt.err (!%p310_p12)
}
 0x133   :  { %s314_s28 = scalar_lea.hbm %s388_s2, 32 }
 0x134   :  { %p315_p13 = scmp.ne.s32.totalorder %s388_s2, %s314_s28  ;;  %p318_p0 = scmp.lt.u32.totalorder %s314_s28, %s388_s2 }
 0x136   :  { %p320_p1 = pnand %p318_p0, %p315_p13 }
 0x138   :  { %323 = shalt.err (!%p320_p1)
}
 0x139   :  { %205 = dma.vmem_to_hbm [thread:$0]  %s203_s24, 32, %s388_s2, [#allocation4]  }
 0x13a   :  { %326 = dma.done.wait [#allocation4], 32  }
 0x13b   :  { %327 = vsyncadd [#allocation4], 4294967264 }
 0x13c   :  { %209 = vsyncpa [#allocation3], 1 }
 0x13d   :  { %210 = vsyncpa [#allocation4], 1 }

</bundles_post_ra>
